<compile_context>
chip_gen: v7x
topology: tpu7x:2x2x1
jax: 0.10.0
libtpu: 0.0.40
codegen_flags: <defaults>
</compile_context>

<pallas_src>
import functools

import jax
import jax.numpy as jnp
from jax.experimental import pallas as pl
from jax.experimental.pallas import tpu as pltpu


def _decoder_kernel(x_ref, w_ref, b_ref, out_ref, acc_c_ref, acc_out_ref, *,
                    inv_spatial):
    # x_ref      : (tile_n, tile_c, tile_s)  activations, spatial on lanes
    # w_ref      : (tile_c, nc_pad)          FC weight slice (torch W transposed)
    # b_ref      : (1, nc_pad)               bias (resident, constant index map)
    # out_ref    : (tile_n, nc_pad)
    # acc_c_ref  : (tile_n, tile_c) f32      spatial-sum accumulator (scratch)
    # acc_out_ref: (tile_n, nc_pad) f32      FC-output accumulator (scratch)
    j = pl.program_id(1)                 # channel tile   (reduction axis)
    k = pl.program_id(2)                 # spatial chunk  (reduction axis)
    nj = pl.num_programs(1)
    nk = pl.num_programs(2)

    @pl.when(jnp.logical_and(j == 0, k == 0))
    def _():
        acc_out_ref[...] = jnp.zeros_like(acc_out_ref)

    @pl.when(k == 0)
    def _():
        acc_c_ref[...] = jnp.zeros_like(acc_c_ref)

    # Partial spatial sum for this block, accumulated in f32.
    acc_c_ref[...] += jnp.sum(x_ref[...].astype(jnp.float32), axis=-1)

    @pl.when(k == nk - 1)
    def _():
        # This channel slice is fully pooled: scale once and fold into the FC.
        pooled = acc_c_ref[...] * inv_spatial                  # (tile_n, tile_c) f32
        acc_out_ref[...] += jnp.dot(pooled.astype(w_ref.dtype), w_ref[...],
                                    preferred_element_type=jnp.float32)

    @pl.when(jnp.logical_and(j == nj - 1, k == nk - 1))
    def _():
        out_ref[...] = (acc_out_ref[...]
                        + b_ref[...].astype(jnp.float32)).astype(out_ref.dtype)


def _round_up(v, m):
    return ((v + m - 1) // m) * m


def _sublane_quantum(dtype):
    # Sublane packing quantum: f32 -> 8, bf16 -> 16, int8/fp8 -> 32.
    return max(8, 32 // jnp.dtype(dtype).itemsize)


def _vmem_capacity_bytes():
    # Per-generation physical VMEM (per TensorCore). Conservative default = v7x.
    try:
        info = pltpu.get_tpu_info()
        for attr in ("vmem_capacity_bytes", "vmem_size_bytes", "vmem_bytes"):
            v = getattr(info, attr, None)
            if v:
                return int(v)
    except Exception:
        pass
    return 64 * 1024 * 1024


def _pick_spatial_tile(s):
    # Largest 128-multiple chunk dividing H*W; otherwise the full (contiguous)
    # spatial extent (e.g. 7*7 = 49), which is always a legal block dim.
    for cand in (2048, 1024, 512, 256, 128):
        if s % cand == 0:
            return cand
    return s


def _footprint_bytes(tile_n, tile_c, tile_s, nc_pad, x_dtype, w_dtype, out_dtype):
    """Layout-aware VMEM plan: 2x-buffered x/w/bias/out blocks + both scratches."""
    x_blk = (tile_n * _round_up(tile_c, _sublane_quantum(x_dtype))
             * _round_up(tile_s, 128) * jnp.dtype(x_dtype).itemsize)
    w_blk = (_round_up(tile_c, _sublane_quantum(w_dtype)) * nc_pad
             * jnp.dtype(w_dtype).itemsize)
    b_blk = _sublane_quantum(w_dtype) * nc_pad * jnp.dtype(w_dtype).itemsize
    o_blk = (_round_up(tile_n, _sublane_quantum(out_dtype)) * nc_pad
             * jnp.dtype(out_dtype).itemsize)
    acc_c = _round_up(tile_n, 8) * _round_up(tile_c, 8) * 4
    acc_o = _round_up(tile_n, 8) * nc_pad * 4
    return 2 * (x_blk + w_blk + b_blk + o_blk) + acc_c + acc_o


def _plan_tiles(n_pad, c, tile_s, nc_pad, x_dtype, w_dtype, out_dtype, budget):
    # Batch-tile candidates: multiples of 8 dividing the padded batch (no
    # full-batch fallback). Prefer the largest (amortizes per-step overhead and
    # the per-batch-tile weight restream), but keep >=2 batch tiles when
    # possible so v7x's two TensorCores both get work.
    n_cands = sorted((t for t in range(8, n_pad + 1, 8) if n_pad % t == 0),
                     reverse=True)
    if n_pad >= 16:
        n_cands = [t for t in n_cands if n_pad // t >= 2] or [8]

    # Channel-tile candidates: full extent, or 8-multiples dividing C.
    if c % 8 == 0:
        c_cands = [c] + [t for t in (4096, 2048, 1024, 512, 256, 128, 64, 32, 16, 8)
                         if t < c and c % t == 0]
    else:
        c_cands = [c]

    for tn in n_cands:
        for tc in c_cands:
            if _footprint_bytes(tn, tc, tile_s, nc_pad,
                                x_dtype, w_dtype, out_dtype) <= budget:
                return tn, tc
    return n_cands[-1], c_cands[-1]      # smallest legal tiling


def resnet_decoder(x, weight, bias, *, param_dtype=None):
    """Global avg-pool over (H, W) followed by Linear, matching ResnetDecoder.

    x: (N, C, H, W); weight: (n_classes, C); bias: (n_classes,).
    Returns (N, n_classes).
    """
    n, c, h, w = x.shape
    s = h * w
    n_classes = weight.shape[0]
    out_dtype = x.dtype

    # Lane-dense layout: flatten H,W onto the lane axis (free for NCHW).
    x3 = x.reshape(n, c, s)

    # Pad batch to a multiple of 8 so the tile picker never needs a full-batch
    # fallback; padded rows just produce bias values and are sliced off.
    n_pad = _round_up(max(n, 8), 8)
    if n_pad != n:
        x3 = jnp.pad(x3, ((0, n_pad - n), (0, 0), (0, 0)))

    # Params: class axis padded to 128 for lane-dense loads / stores.  Keeping
    # the incoming dtype preserves f32 numerics; pass param_dtype=jnp.bfloat16
    # to halve resident weight VMEM / DMA for large C (mixed-precision head).
    w_dtype = jnp.dtype(param_dtype) if param_dtype is not None else weight.dtype
    nc_pad = _round_up(n_classes, 128)
    w_t = jnp.pad(weight.T, ((0, 0), (0, nc_pad - n_classes))).astype(w_dtype)
    b2d = jnp.pad(bias, (0, nc_pad - n_classes)).reshape(1, nc_pad).astype(w_dtype)

    # Per-generation VMEM plan: ~48 MiB on v7x (64 MiB physical), ~96 MiB on
    # v5e/v6e (128 MiB physical), with headroom for compiler-internal scratch.
    cap = _vmem_capacity_bytes()
    vmem_limit = min((cap * 3) // 4, 96 * 1024 * 1024)
    budget = int(vmem_limit * 0.85)

    tile_s = _pick_spatial_tile(s)
    tile_n, tile_c = _plan_tiles(n_pad, c, tile_s, nc_pad,
                                 x3.dtype, w_dtype, out_dtype, budget)
    plan = _footprint_bytes(tile_n, tile_c, tile_s, nc_pad,
                            x3.dtype, w_dtype, out_dtype)
    vmem_limit = max(vmem_limit, min(cap, plan + (4 << 20)))

    grid = (n_pad // tile_n, c // tile_c, s // tile_s)
    kernel = functools.partial(_decoder_kernel, inv_spatial=1.0 / float(s))

    out_padded = pl.pallas_call(
        kernel,
        out_shape=jax.ShapeDtypeStruct((n_pad, nc_pad), out_dtype),
        grid_spec=pltpu.PrefetchScalarGridSpec(
            num_scalar_prefetch=0,
            grid=grid,
            in_specs=[
                # Activations: streamed tile-by-tile, auto double-buffered.
                pl.BlockSpec((tile_n, tile_c, tile_s), lambda i, j, k: (i, j, k)),
                # FC weight slice for this channel tile; constant across the
                # spatial axis, restreamed only when the channel tile changes.
                pl.BlockSpec((tile_c, nc_pad), lambda i, j, k: (j, 0)),
                # Bias: constant index map -> resident.
                pl.BlockSpec((1, nc_pad), lambda i, j, k: (0, 0)),
            ],
            # Output block ignores both reduction axes -> accumulator-style
            # residency; written only in the final (j, k) epilogue.
            out_specs=pl.BlockSpec((tile_n, nc_pad), lambda i, j, k: (i, 0)),
            scratch_shapes=[
                pltpu.VMEM((tile_n, tile_c), jnp.float32),   # spatial-sum acc
                pltpu.VMEM((tile_n, nc_pad), jnp.float32),   # FC output acc
            ],
        ),
        compiler_params=pltpu.CompilerParams(
            dimension_semantics=("parallel", "arbitrary", "arbitrary"),
            vmem_limit_bytes=int(vmem_limit),
        ),
    )(x3, w_t, b2d)

    return out_padded[:n, :n_classes]


if __name__ == "__main__":
    # Small shapes consistent with the module: batch=2, in_features=4,
    # spatial=16x16, n_classes=10.
    N, C, H, W = 2, 4, 16, 16
    n_classes = 10

    key = jax.random.PRNGKey(0)
    kx, kw, kb = jax.random.split(key, 3)

    x = jax.random.normal(kx, (N, C, H, W), dtype=jnp.float32)
    # Deterministic params with nn.Linear(in_features, n_classes) shapes.
    bound = 1.0 / (C ** 0.5)
    weight = jax.random.uniform(kw, (n_classes, C), jnp.float32, -bound, bound)
    bias = jax.random.uniform(kb, (n_classes,), jnp.float32, -bound, bound)

    out = resnet_decoder(x, weight, bias)
    jax.block_until_ready(out)

    # Cross-check against a plain-JAX reference of the same forward pass.
    ref = jnp.mean(x, axis=(2, 3)) @ weight.T + bias
    assert out.shape == (N, n_classes)
    assert jnp.allclose(out, ref, atol=1e-5, rtol=1e-5)

    print("KERNEL_OK")
</pallas_src>

<mosaic_0001>
module attributes {stable_mosaic.version = 11 : i64} {
  func.func @_decoder_kernel(%arg0: i32, %arg1: i32, %arg2: i32, %arg3: memref<8x4x256xf32, #tpu.memory_space<vmem>>, %arg4: memref<4x128xf32, #tpu.memory_space<vmem>>, %arg5: memref<1x128xf32, #tpu.memory_space<vmem>>, %arg6: memref<8x128xf32, #tpu.memory_space<vmem>>, %arg7: memref<8x4xf32, #tpu.memory_space<vmem>>, %arg8: memref<8x128xf32, #tpu.memory_space<vmem>>) attributes {dimension_semantics = [#tpu.dimension_semantics<parallel>, #tpu.dimension_semantics<arbitrary>, #tpu.dimension_semantics<arbitrary>], iteration_bounds = array<i64: 1, 1, 1>, scalar_prefetch = 0 : i64, scratch_operands = 2 : i64, tpu.core_type = #tpu.core_type<tc>, window_params = [{transform_indices = @transform_0, window_bounds = array<i64: 8, 4, 256>}, {transform_indices = @transform_1, window_bounds = array<i64: 4, 128>}, {pipeline_mode = #tpu.pipeline_mode<synchronous>, transform_indices = @transform_2, window_bounds = array<i64: 1, 128>}, {transform_indices = @transform_3, window_bounds = array<i64: 8, 128>}]} {
    %c0_i32 = arith.constant 0 : i32
    %0 = arith.cmpi eq, %arg1, %c0_i32 : i32
    %c0_i32_0 = arith.constant 0 : i32
    %1 = arith.cmpi eq, %arg2, %c0_i32_0 : i32
    %2 = arith.andi %0, %1 : i1
    %3 = arith.extui %2 : i1 to i32
    %c0_i32_1 = arith.constant 0 : i32
    %4 = arith.cmpi ne, %3, %c0_i32_1 : i32
    scf.if %4 {
      %cst_15 = arith.constant 0.000000e+00 : f32
      %21 = vector.broadcast %cst_15 : f32 to vector<8x128xf32>
      %c0_16 = arith.constant 0 : index
      %c0_17 = arith.constant 0 : index
      %22 = vector.load %arg8[%c0_16, %c0_17] : memref<8x128xf32, #tpu.memory_space<vmem>>, vector<8x128xf32>
      tpu.vector_store %arg8[%c0_16, %c0_17], %21 {strides = array<i32>} : memref<8x128xf32, #tpu.memory_space<vmem>>, vector<8x128xf32>,
    } else {
    }
    %c0_i32_2 = arith.constant 0 : i32
    %5 = arith.cmpi eq, %arg2, %c0_i32_2 : i32
    %6 = arith.extui %5 : i1 to i32
    %c0_i32_3 = arith.constant 0 : i32
    %7 = arith.cmpi ne, %6, %c0_i32_3 : i32
    scf.if %7 {
      %cst_15 = arith.constant 0.000000e+00 : f32
      %21 = vector.broadcast %cst_15 : f32 to vector<8x4xf32>
      %c0_16 = arith.constant 0 : index
      %c0_17 = arith.constant 0 : index
      %22 = vector.load %arg7[%c0_16, %c0_17] : memref<8x4xf32, #tpu.memory_space<vmem>>, vector<8x4xf32>
      tpu.vector_store %arg7[%c0_16, %c0_17], %21 {strides = array<i32>} : memref<8x4xf32, #tpu.memory_space<vmem>>, vector<8x4xf32>,
    } else {
    }
    %c0 = arith.constant 0 : index
    %c0_4 = arith.constant 0 : index
    %8 = vector.load %arg7[%c0, %c0_4] : memref<8x4xf32, #tpu.memory_space<vmem>>, vector<8x4xf32>
    %c0_5 = arith.constant 0 : index
    %c0_6 = arith.constant 0 : index
    %c0_7 = arith.constant 0 : index
    %9 = vector.load %arg3[%c0_5, %c0_6, %c0_7] : memref<8x4x256xf32, #tpu.memory_space<vmem>>, vector<8x4x256xf32>
    %cst = arith.constant dense<0.000000e+00> : vector<8x4xf32>
    %10 = vector.multi_reduction <add>, %9, %cst [2] : vector<8x4x256xf32> to vector<8x4xf32>
    %11 = arith.addf %8, %10 : vector<8x4xf32>
    %c0_8 = arith.constant 0 : index
    %c0_9 = arith.constant 0 : index
    %12 = vector.load %arg7[%c0_8, %c0_9] : memref<8x4xf32, #tpu.memory_space<vmem>>, vector<8x4xf32>
    tpu.vector_store %arg7[%c0_8, %c0_9], %11 {strides = array<i32>} : memref<8x4xf32, #tpu.memory_space<vmem>>, vector<8x4xf32>,
    %c0_i32_10 = arith.constant 0 : i32
    %13 = arith.cmpi eq, %arg2, %c0_i32_10 : i32
    %14 = arith.extui %13 : i1 to i32
    %c0_i32_11 = arith.constant 0 : i32
    %15 = arith.cmpi ne, %14, %c0_i32_11 : i32
    scf.if %15 {
      %c0_15 = arith.constant 0 : index
      %c0_16 = arith.constant 0 : index
      %21 = vector.load %arg7[%c0_15, %c0_16] : memref<8x4xf32, #tpu.memory_space<vmem>>, vector<8x4xf32>
      %cst_17 = arith.constant 3.906250e-03 : f32
      %22 = vector.broadcast %cst_17 : f32 to vector<8x4xf32>
      %23 = arith.mulf %21, %22 : vector<8x4xf32>
      %c0_18 = arith.constant 0 : index
      %c0_19 = arith.constant 0 : index
      %24 = vector.load %arg8[%c0_18, %c0_19] : memref<8x128xf32, #tpu.memory_space<vmem>>, vector<8x128xf32>
      %c0_20 = arith.constant 0 : index
      %c0_21 = arith.constant 0 : index
      %25 = vector.load %arg4[%c0_20, %c0_21] : memref<4x128xf32, #tpu.memory_space<vmem>>, vector<4x128xf32>
      %cst_22 = arith.constant dense<0.000000e+00> : vector<8x128xf32>
      %26 = tpu.matmul %23, %25, %cst_22 {dimension_numbers = #tpu.dot_dimension_numbers<[1], [0], [0], [1], [0, 0, 1, 1], [], []>} : vector<8x4xf32>, vector<4x128xf32>, vector<8x128xf32> -> vector<8x128xf32>
      %27 = arith.addf %24, %26 : vector<8x128xf32>
      %c0_23 = arith.constant 0 : index
      %c0_24 = arith.constant 0 : index
      %28 = vector.load %arg8[%c0_23, %c0_24] : memref<8x128xf32, #tpu.memory_space<vmem>>, vector<8x128xf32>
      tpu.vector_store %arg8[%c0_23, %c0_24], %27 {strides = array<i32>} : memref<8x128xf32, #tpu.memory_space<vmem>>, vector<8x128xf32>,
    } else {
    }
    %c0_i32_12 = arith.constant 0 : i32
    %16 = arith.cmpi eq, %arg1, %c0_i32_12 : i32
    %c0_i32_13 = arith.constant 0 : i32
    %17 = arith.cmpi eq, %arg2, %c0_i32_13 : i32
    %18 = arith.andi %16, %17 : i1
    %19 = arith.extui %18 : i1 to i32
    %c0_i32_14 = arith.constant 0 : i32
    %20 = arith.cmpi ne, %19, %c0_i32_14 : i32
    scf.if %20 {
      %c0_15 = arith.constant 0 : index
      %c0_16 = arith.constant 0 : index
      %21 = vector.load %arg8[%c0_15, %c0_16] : memref<8x128xf32, #tpu.memory_space<vmem>>, vector<8x128xf32>
      %c0_17 = arith.constant 0 : index
      %c0_18 = arith.constant 0 : index
      %22 = vector.load %arg5[%c0_17, %c0_18] : memref<1x128xf32, #tpu.memory_space<vmem>>, vector<1x128xf32>
      %23 = vector.broadcast %22 : vector<1x128xf32> to vector<8x128xf32>
      %24 = arith.addf %21, %23 : vector<8x128xf32>
      %c0_19 = arith.constant 0 : index
      %c0_20 = arith.constant 0 : index
      %25 = vector.load %arg6[%c0_19, %c0_20] : memref<8x128xf32, #tpu.memory_space<vmem>>, vector<8x128xf32>
      tpu.vector_store %arg6[%c0_19, %c0_20], %24 {strides = array<i32>} : memref<8x128xf32, #tpu.memory_space<vmem>>, vector<8x128xf32>,
    } else {
    }
    return
  }
  func.func @transform_0(%arg0: i32, %arg1: i32, %arg2: i32) -> (i32, i32, i32) {
    %c0_i32 = arith.constant 0 : i32
    return %arg0, %arg1, %arg2 : i32, i32, i32
  }
  func.func @transform_1(%arg0: i32, %arg1: i32, %arg2: i32) -> (i32, i32) {
    %c0_i32 = arith.constant 0 : i32
    %c0_i32_0 = arith.constant 0 : i32
    return %arg1, %c0_i32 : i32, i32
  }
  func.func @transform_2(%arg0: i32, %arg1: i32, %arg2: i32) -> (i32, i32) {
    %c0_i32 = arith.constant 0 : i32
    %c0_i32_0 = arith.constant 0 : i32
    %c0_i32_1 = arith.constant 0 : i32
    return %c0_i32, %c0_i32_0 : i32, i32
  }
  func.func @transform_3(%arg0: i32, %arg1: i32, %arg2: i32) -> (i32, i32) {
    %c0_i32 = arith.constant 0 : i32
    %c0_i32_0 = arith.constant 0 : i32
    return %arg0, %c0_i32 : i32, i32
  }
}

</mosaic_0001>

<bundles_post_ra>
// kernel: tpu_custom_call.1
= control target key start
LH: loop header
LB: loop body
LE: loop exit
PB: predicated region body
PF: predicated region fallthrough
CT: control target
= control target key end

     0   :  { %8 = vsyncpa [#allocation5], 0  ;;  %s483_s0 = inlined_call_operand.hbm [shape: f32[8,4,256], index: 0, kind: input, shape index: {}]   ;;  %s484_s1 = inlined_call_operand.hbm [shape: f32[4,128], index: 1, kind: input, shape index: {}]   ;;  %s485_s2 = inlined_call_operand.vmem [shape: f32[1,128], index: 2, kind: input, shape index: {}]   ;;  %s486_s3 = inlined_call_operand.hbm [shape: f32[8,128], index: 3, kind: output, shape index: {}]  }
   0x1   :  { %9 = vsyncpa [#allocation8], 0 }
   0x2   :  { %10 = vsyncpa [#allocation6], 0  ;;  %s397_s12 = smov [#allocation4]   ;;  %s325_s16 = scalar_lea.hbm %s483_s0, 1024 }
   0x3   :  { %s16_s13 = sshll.u32 %s397_s12, 4  ;;  %p326_p0 = scmp.ne.s32.totalorder %s483_s0, %s325_s16  ;;  %s17_s13 = int_to_ptr.vmem [resolvable:$true] %s16_s13 }
   0x4   :  { %p329_p1 = scmp.lt.u32.totalorder %s325_s16, %s483_s0 }
   0x6   :  { %p331_p2 = pnand %p329_p1, %p326_p0 }
   0x8   :  { %334 = shalt.err (!%p331_p2)
}
   0x9   :  { %s335_s21 = scalar_lea.vmem %s17_s13, 1024  ;;  %p340_p4 = scmp.lt.s32.totalorder %s17_s13, %s17_s13 }
   0xa   :  { %p336_p3 = scmp.ne.s32.totalorder %s17_s13, %s335_s21  ;;  %p341_p5 = scmp.lt.s32.totalorder %s335_s21, %s335_s21 }
   0xc   :  { %p342_p6 = por %p341_p5, %p340_p4 }
   0xe   :  { %p343_p7 = pnand %p342_p6, %p336_p3 }
  0x10   :  { %346 = shalt.err (!%p343_p7)
}
  0x11   :  { %s398_s22 = smov 128   ;;  %s399_s23 = smov 8  }
  0x12   :  { %22 = dma.hbm_to_vmem [thread:$0]  %s483_s0, 1024, %s17_s13, [#allocation5], %s398_s22, %s398_s22, %s399_s23  }
  0x13   :  { %s400_s26 = smov [#allocation7]   ;;  %s347_s30 = scalar_lea.hbm %s484_s1, 64 }
  0x14   :  { %s29_s27 = sshll.u32 %s400_s26, 4  ;;  %p348_p8 = scmp.ne.s32.totalorder %s484_s1, %s347_s30  ;;  %s30_s27 = int_to_ptr.vmem [resolvable:$true] %s29_s27 }
  0x15   :  { %p351_p9 = scmp.lt.u32.totalorder %s347_s30, %s484_s1 }
  0x17   :  { %p353_p10 = pnand %p351_p9, %p348_p8 }
  0x19   :  { %356 = shalt.err (!%p353_p10)
}
  0x1a   :  { %s357_s8 = scalar_lea.vmem %s30_s27, 64  ;;  %p362_p12 = scmp.lt.s32.totalorder %s30_s27, %s30_s27 }
  0x1b   :  { %p358_p11 = scmp.ne.s32.totalorder %s30_s27, %s357_s8  ;;  %p363_p13 = scmp.lt.s32.totalorder %s357_s8, %s357_s8 }
  0x1d   :  { %p364_p0 = por %p363_p13, %p362_p12 }
  0x1f   :  { %p365_p1 = pnand %p364_p0, %p358_p11 }
  0x21   :  { %368 = shalt.err (!%p365_p1)
}
  0x22   :  { %32 = dma.hbm_to_vmem [thread:$0]  %s484_s1, 64, %s30_s27, [#allocation8]  }
  0x23   :  { %391 = dma.done.wait [#allocation5], 1024  }
  0x24   :  { %392 = vsyncadd [#allocation5], 4294966272 }
  0x25   :  { %393 = dma.done.wait [#allocation8], 64  }
  0x26   :  { %394 = vsyncadd [#allocation8], 4294967232  ;;  %vm86_vm0 = vcmask 1043456   ;;  %v54_v0 = vld [vmem:[#allocation4] sm:$0xff]  ;;  %v56_v1 = vld [vmem:[#allocation4 + $0x10] sm:$0xff]  ;;  %vm51_vm1 = vcmask 31744   ;;  %v135_v42 = vlaneseq }
  0x27   :  { %v55_v2 = vld [vmem:[#allocation4 + $0x8] sm:$0xff]  ;;  %v70_v3 = vcombine.high %v54_v0, %v54_v0  ;;  %v87_v4 = vsel %vm86_vm0, %v54_v0, 0.0  ;;  %v72_v5 = vcombine.high %v56_v1, %v56_v1  ;;  %v97_v6 = vsel %vm86_vm0, %v56_v1, 0.0  ;;  %v57_v7 = vld [vmem:[#allocation4 + $0x18] sm:$0xff]  ;;  %v58_v8 = vld [vmem:[#allocation4 + $0x20] sm:$0xff]  ;;  %s403_s11 = smov [#allocation9]  }
  0x28   :  { %v71_v9 = vcombine.high %v55_v2, %v55_v2  ;;  %v92_v10 = vsel %vm86_vm0, %v55_v2, 0.0  ;;  %v73_v11 = vcombine.high %v57_v7, %v57_v7  ;;  %v59_v12 = vld [vmem:[#allocation4 + $0x28] sm:$0xff]  ;;  %v102_v15 = vsel %vm86_vm0, %v57_v7, 0.0  ;;  %v60_v21 = vld [vmem:[#allocation4 + $0x30] sm:$0xff]  ;;  %v61_v22 = vld [vmem:[#allocation4 + $0x38] sm:$0xff]  ;;  %s290_s12 = sshll.u32 %s403_s11, 4  ;;  %s291_s12 = int_to_ptr.vmem [resolvable:$true] %s290_s12 }
  0x29   :  { %v88_v13 = vsel %vm86_vm0, %v70_v3, 0.0  ;;  %v98_v14 = vsel %vm86_vm0, %v72_v5, 0.0  ;;  %v74_v16 = vcombine.high %v58_v8, %v58_v8  ;;  %v75_v23 = vcombine.high %v59_v12, %v59_v12  ;;  %v193_v41 = vld [vmem:[#allocation7] sm:$0xf]  ;;  %s369_s13 = scalar_lea.vmem %s291_s12, 128  ;;  %p374_p3 = scmp.lt.s32.totalorder %s291_s12, %s291_s12 }
  0x2a   :  { %v89_v17 = vadd.f32 %v88_v13, %v87_v4  ;;  %v99_v18 = vadd.f32 %v98_v14, %v97_v6  ;;  %v93_v19 = vsel %vm86_vm0, %v71_v9, 0.0  ;;  %v103_v20 = vsel %vm86_vm0, %v73_v11, 0.0  ;;  %v302_v9 = vld [vmem:[%s485_s2] ss:$0 sm:$0xff]  ;;  %p370_p2 = scmp.ne.s32.totalorder %s291_s12, %s369_s13  ;;  %p375_p4 = scmp.lt.s32.totalorder %s369_s13, %s369_s13 }
  0x2b   :  { %v94_v24 = vadd.f32 %v93_v19, %v92_v10  ;;  %v104_v25 = vadd.f32 %v103_v20, %v102_v15  ;;  %v107_v26 = vsel %vm86_vm0, %v58_v8, 0.0  ;;  %v108_v27 = vsel %vm86_vm0, %v74_v16, 0.0 }
  0x2c   :  { %90 = vadd.xlane.f32.xlu0 %v89_v17  ;;  %100 = vadd.xlane.f32.xlu1 %v99_v18  ;;  %v112_v28 = vsel %vm86_vm0, %v59_v12, 0.0  ;;  %v113_v29 = vsel %vm86_vm0, %v75_v23, 0.0  ;;  %v76_v30 = vcombine.high %v60_v21, %v60_v21  ;;  %v77_v31 = vcombine.high %v61_v22, %v61_v22  ;;  %p376_p5 = por %p375_p4, %p374_p3 }
  0x2d   :  { %v109_v32 = vadd.f32 %v108_v27, %v107_v26  ;;  %v114_v33 = vadd.f32 %v113_v29, %v112_v28  ;;  %v117_v34 = vsel %vm86_vm0, %v60_v21, 0.0  ;;  %v122_v36 = vsel %vm86_vm0, %v61_v22, 0.0 }
  0x2e   :  { %v118_v35 = vsel %vm86_vm0, %v76_v30, 0.0  ;;  %v123_v37 = vsel %vm86_vm0, %v77_v31, 0.0  ;;  %v401_v40 = vmov 0.0   ;;  %vm402_vm2 = vmmov 0   ;;  %p377_p6 = pnand %p376_p5, %p370_p2 }
  0x2f   :  { %v119_v38 = vadd.f32 %v118_v35, %v117_v34  ;;  %v124_v39 = vadd.f32 %v123_v37, %v122_v36  ;;  %305 = vmatprep.subr.mxu0 %v401_v40  ;;  %52 = vst.msk [vmem:[#allocation2] sm:$0xff] %vm51_vm1, %v401_v40  ;;  %307 = vmatprep.mubr.msk.f32.mxu0 %vm402_vm2, %v401_v40  ;;  %v136_v43 = vand.u32 127, %v135_v42  ;;  %v138_v44 = vshrl.u32 %v135_v42, 7 }
  0x30   :  { %95 = vadd.xlane.f32.xlu0 %v94_v24  ;;  %105 = vadd.xlane.f32.xlu1 %v104_v25  ;;  %vm169_vm3 = vcmask 1041409   ;;  %vm171_vm4 = vcmask 1042434   ;;  %vm173_vm5 = vcmask 1043459   ;;  %vm175_vm6 = vcmask 1044484  }
  0x31   :  { %306 = vmatpush3.msk.msra.mxu0 %vm86_vm0, %v193_v41  ;;  %v139_v47 = vsub.s32 %v136_v43, %v138_v44  ;;  %vm177_vm7 = vcmask 1045509   ;;  %vm179_vm8 = vcmask 1046534   ;;  %vm181_vm9 = vcmask 1047559  }
  0x34   :  { %110 = vadd.xlane.f32.xlu0 %v109_v32  ;;  %115 = vadd.xlane.f32.xlu1 %v114_v33 }
  0x36   :  { %v53_v3 = vld [vmem:[#allocation2] sm:$0xff] }
  0x38   :  { %120 = vadd.xlane.f32.xlu0 %v119_v38  ;;  %125 = vadd.xlane.f32.xlu1 %v124_v39 }
  0xb9   :  { %v91_v45 = vpop.xlane.xlu0 %90  ;;  %v101_v46 = vpop.xlane.xlu1 %100 }
  0xba   :  { %v140_v50 = vrot.slane %v91_v45, %v139_v47  ;;  %v148_v53 = vrot.slane %v101_v46, %v139_v47 }
  0xbd   :  { %v96_v48 = vpop.xlane.xlu0 %95  ;;  %v106_v49 = vpop.xlane.xlu1 %105 }
  0xbe   :  { %v144_v51 = vrot.slane %v96_v48, %v139_v47  ;;  %v152_v52 = vrot.slane %v106_v49, %v139_v47 }
  0xc0   :  { %v170_v54 = vsel %vm169_vm3, %v144_v51, %v140_v50 }
  0xc1   :  { %v172_v55 = vsel %vm171_vm4, %v148_v53, %v170_v54  ;;  %v111_v56 = vpop.xlane.xlu0 %110  ;;  %v116_v57 = vpop.xlane.xlu1 %115 }
  0xc2   :  { %v174_v58 = vsel %vm173_vm5, %v152_v52, %v172_v55  ;;  %v156_v59 = vrot.slane %v111_v56, %v139_v47  ;;  %v160_v60 = vrot.slane %v116_v57, %v139_v47 }
  0xc4   :  { %v176_v61 = vsel %vm175_vm6, %v156_v59, %v174_v58 }
  0xc5   :  { %v121_v62 = vpop.xlane.xlu0 %120  ;;  %v126_v63 = vpop.xlane.xlu1 %125  ;;  %v178_v2 = vsel %vm177_vm7, %v160_v60, %v176_v61 }
  0xc6   :  { %v164_v0 = vrot.slane %v121_v62, %v139_v47  ;;  %v168_v1 = vrot.slane %v126_v63, %v139_v47 }
  0xc8   :  { %v180_v4 = vsel %vm179_vm8, %v164_v0, %v178_v2 }
  0xc9   :  { %v182_v5 = vsel %vm181_vm9, %v168_v1, %v180_v4 }
  0xca   :  { %v184_v6 = vadd.f32 %v182_v5, %v53_v3 }
  0xcc   :  { %186 = vst.msk [vmem:[#allocation2] sm:$0xff] %vm51_vm1, %v184_v6 }
  0xd3   :  { %v190_v7 = vld [vmem:[#allocation2] sm:$0xff] }
  0xd4   :  { %v191_v8 = vmul.f32 0.00390625, %v190_v7 }
  0xd6   :  { %308 = vmatmul.mubr.msk.f32.vlgmr.msra.gmra.mrb[0].mxu0 %vm51_vm1, %v191_v8 }
 0x1a9   :  { %v266_v10 = vpop.f32.mrb[0].mxu0 }
 0x1aa   :  { %v282_v11 = vadd.f32 %v302_v9, %v266_v10  ;;  %v309_v12 = vpop.f32.mrb[1].mxu0 }
 0x1ac   :  { %283 = vst [vmem:[#allocation9] sm:$0xff] %v282_v11 }
 0x1ad   :  { %380 = shalt.err (!%p377_p6)
}
 0x1ae   :  { %s381_s16 = scalar_lea.hbm %s486_s3, 128 }
 0x1af   :  { %p382_p7 = scmp.ne.s32.totalorder %s486_s3, %s381_s16  ;;  %p385_p8 = scmp.lt.u32.totalorder %s381_s16, %s486_s3 }
 0x1b1   :  { %p387_p9 = pnand %p385_p8, %p382_p7 }
 0x1b3   :  { %390 = shalt.err (!%p387_p9)
}
 0x1b4   :  { %293 = dma.vmem_to_hbm [thread:$0]  %s291_s12, 128, %s486_s3, [#allocation6]  }
 0x1b5   :  { %395 = dma.done.wait [#allocation6], 128  }
 0x1b6   :  { %396 = vsyncadd [#allocation6], 4294967168 }
 0x1b7   :  { %297 = vsyncpa [#allocation5], 1 }
 0x1b8   :  { %298 = vsyncpa [#allocation8], 1 }
 0x1b9   :  { %299 = vsyncpa [#allocation6], 1 }

</bundles_post_ra>
